<compile_context>
chip_gen: v6e
topology: v6e:2x2x1
jax: 0.10.0
libtpu: 0.0.40
codegen_flags: <defaults>
</compile_context>

<pallas_src>
import numpy as np
import jax
import jax.numpy as jnp
from jax import lax
from jax.experimental import pallas as pl
from jax.experimental.pallas import tpu as pltpu


def _round_up(x: int, m: int) -> int:
    return ((x + m - 1) // m) * m


# ----------------------------------------------------------------------------
# Kernel factory: whole relaxation (num_steps) in a single invocation
# ----------------------------------------------------------------------------
def make_relax_kernel(n_state: int, num_steps: int, beta: float,
                      has_target: bool, unroll: int):
    """Ref order (positional):
         [target (only if has_target)],
         s[0..n_state-1],              # initial states (s[-1] = clamped data)
         W0T,                          # (pad_l[1], pad_l[0])  layer-0 weight^T
         Wcat[0..n_w-2],               # fused [W[i].T ; W[i-1]] per hidden layer
         b[0..n_w-1],                  # biases, (1, pad_l[i]) float32
         out[0..n_w-1]                 # final free-layer states
    """
    n_w = n_state - 1

    def kernel(*refs):
        idx = 0
        target = None
        if has_target:
            target = refs[0][...]
            idx = 1
        s_refs = refs[idx: idx + n_state]
        w0_ref = refs[idx + n_state]
        wcat_refs = refs[idx + n_state + 1: idx + n_state + n_w]
        b_refs = refs[idx + n_state + n_w: idx + n_state + 2 * n_w]
        out_refs = refs[idx + n_state + 2 * n_w:]

        # ---- loop-invariant loads (done once, kept resident) ----------------
        data = s_refs[n_state - 1][...]
        w0 = w0_ref[...]
        wcat = [wcat_refs[i][...] for i in range(n_w - 1)]
        # Hoisted bias broadcasts: (1, N) -> (tile_b, N), once, outside the loop.
        b_full = [jnp.broadcast_to(b_refs[i][...], s_refs[i].shape)
                  for i in range(n_w)]

        def rho(x):  # hard-sigmoid
            return jnp.clip(x, 0.0, 1.0)

        def body(_, carry):
            s = list(carry) + [data]
            new = []
            # dsdt[0] = rho(W0(s[1]))  (+ beta*(target - s[0]) in nudged phase)
            d0 = rho(jnp.dot(s[1], w0, preferred_element_type=jnp.float32)
                     + b_full[0])
            if has_target:
                d0 = jnp.clip(d0 + beta * (target - s[0]), 0.0, 1.0)
            new.append(d0.astype(s[0].dtype))
            # dsdt[i] = rho(W_i(s[i+1]) + s[i-1] @ W_{i-1})  -- fused single dot
            for i in range(1, n_w):
                lhs = jnp.concatenate([s[i + 1], s[i - 1]], axis=1)
                di = rho(jnp.dot(lhs, wcat[i - 1],
                                 preferred_element_type=jnp.float32)
                         + b_full[i])
                new.append(di.astype(s[i].dtype))
            return tuple(new)

        init = tuple(s_refs[i][...] for i in range(n_w))
        final = lax.fori_loop(0, num_steps, body, init, unroll=unroll)

        for i in range(n_w):
            out_refs[i][...] = final[i].astype(out_refs[i].dtype)

    return kernel


# ----------------------------------------------------------------------------
# One-time parameter preparation (per weight update, reused across phases)
# ----------------------------------------------------------------------------
def prepare_params(layers, weights, biases, dtype=jnp.float32):
    """Pad, transpose and K-concatenate the weights once.

    Returns a dict consumed by `relax_forward`.  `dtype` is the MXU operand
    dtype (default float32; bf16 optional, see TODO above)."""
    n_state = len(layers)
    n_w = n_state - 1
    pad_l = [_round_up(int(l), 128) for l in layers]

    def pad2(x, rows, cols, dt):
        x = jnp.asarray(x, jnp.float32)
        x = jnp.pad(x, ((0, rows - x.shape[0]), (0, cols - x.shape[1])))
        return x.astype(dt)

    # layer-0 feedforward weight, pre-transposed: (pad_l[1], pad_l[0])
    w0 = pad2(jnp.asarray(weights[0], jnp.float32).T, pad_l[1], pad_l[0], dtype)

    # fused hidden-layer weights: [ W[i].T ; W[i-1] ]  (pad_l[i+1]+pad_l[i-1], pad_l[i])
    wcat = []
    for i in range(1, n_w):
        top = pad2(jnp.asarray(weights[i], jnp.float32).T,
                   pad_l[i + 1], pad_l[i], dtype)
        bot = pad2(jnp.asarray(weights[i - 1], jnp.float32),
                   pad_l[i - 1], pad_l[i], dtype)
        wcat.append(jnp.concatenate([top, bot], axis=0))

    # biases stay float32 (added to the f32 accumulator)
    b_pad = [pad2(jnp.asarray(biases[i], jnp.float32).reshape(1, -1),
                  1, pad_l[i], jnp.float32) for i in range(n_w)]

    return dict(pad_l=pad_l, w0=w0, wcat=wcat, b=b_pad, dtype=dtype)


# ----------------------------------------------------------------------------
# Wrapper: full relaxation (== Network_fc_bin_W.forward with optim='ep')
# ----------------------------------------------------------------------------
def relax_forward(layers, params, s, num_steps, beta=0.0, target=None):
    """s is the full state list (len == len(layers)); s[-1] is the clamped data."""
    n_state = len(layers)
    n_w = n_state - 1
    pad_l = params["pad_l"]
    dtype = params["dtype"]
    batch = s[-1].shape[0]

    # batch padding / optional batch grid (shards across v7x's two TCs)
    pad_b = max(8, _round_up(batch, 8))
    if pad_b >= 256:
        tb = 128
        pad_b = _round_up(pad_b, tb)
    else:
        tb = pad_b
    n_tiles = pad_b // tb

    def pad_state(x, cols):
        x = jnp.asarray(x, jnp.float32)
        x = jnp.pad(x, ((0, pad_b - x.shape[0]), (0, cols - x.shape[1])))
        return x.astype(dtype)

    s_pad = [pad_state(s[i], pad_l[i]) for i in range(n_state)]

    has_target = float(beta) != 0.0
    if has_target and target is None:
        raise ValueError("target must be provided when beta != 0")

    batch_map = lambda b: (b, 0)   # batch-tiled arrays
    const_map = lambda b: (0, 0)   # resident weights / biases

    inputs, in_specs = [], []
    if has_target:
        inputs.append(pad_state(target, pad_l[0]))
        in_specs.append(pl.BlockSpec((tb, pad_l[0]), batch_map))
    inputs += s_pad
    in_specs += [pl.BlockSpec((tb, pad_l[i]), batch_map) for i in range(n_state)]
    inputs.append(params["w0"])
    in_specs.append(pl.BlockSpec((pad_l[1], pad_l[0]), const_map))
    inputs += params["wcat"]
    in_specs += [pl.BlockSpec((pad_l[i + 1] + pad_l[i - 1], pad_l[i]), const_map)
                 for i in range(1, n_w)]
    inputs += params["b"]
    in_specs += [pl.BlockSpec((1, pad_l[i]), const_map) for i in range(n_w)]

    out_specs = tuple(pl.BlockSpec((tb, pad_l[i]), batch_map) for i in range(n_w))
    out_shape = tuple(jax.ShapeDtypeStruct((pad_b, pad_l[i]), dtype)
                      for i in range(n_w))

    # alias the initial-state inputs to the state outputs (in-place update)
    off = 1 if has_target else 0
    io_aliases = {off + i: i for i in range(n_w)}

    # unroll policy: full unroll only if the carried state fits comfortably in
    # the vreg file, otherwise small partial unroll.
    itemsize = jnp.dtype(dtype).itemsize
    carry_bytes = tb * sum(pad_l[:n_w]) * itemsize
    if int(num_steps) <= 8 and carry_bytes <= (96 << 10):
        unroll = max(1, int(num_steps))
    else:
        unroll = max(1, min(4, int(num_steps)))

    # resident block footprint -> VMEM request (x2 default double buffers + headroom);
    # never blanket-request the full physical VMEM (64 MiB on v7x).
    blk = 0
    if has_target:
        blk += tb * pad_l[0] * itemsize
    blk += sum(tb * pad_l[i] for i in range(n_state)) * itemsize          # states
    blk += pad_l[1] * pad_l[0] * itemsize                                 # W0^T
    blk += sum((pad_l[i + 1] + pad_l[i - 1]) * pad_l[i]
               for i in range(1, n_w)) * itemsize                        # fused W
    blk += sum(pad_l[:n_w]) * 4                                           # biases
    blk += sum(tb * pad_l[i] for i in range(n_w)) * itemsize              # outputs
    vmem_limit = int(min(max(2 * blk + (4 << 20), 8 << 20), 112 << 20))

    kernel = make_relax_kernel(n_state, int(num_steps), float(beta),
                               has_target, unroll)

    fn = pl.pallas_call(
        kernel,
        out_shape=out_shape,
        grid_spec=pltpu.PrefetchScalarGridSpec(
            num_scalar_prefetch=0,
            grid=(n_tiles,),               # 1 for small batches; >1 shards rows
            in_specs=in_specs,
            out_specs=out_specs,
        ),
        input_output_aliases=io_aliases,
        compiler_params=pltpu.CompilerParams(
            dimension_semantics=("parallel",),
            vmem_limit_bytes=vmem_limit,
        ),
    )

    outs = fn(*inputs)
    if not isinstance(outs, (tuple, list)):
        outs = (outs,)
    result = [outs[i][:batch, :layers[i]].astype(jnp.float32) for i in range(n_w)]
    return result + [jnp.asarray(s[-1], jnp.float32)]


# ----------------------------------------------------------------------------
# Deterministic parameter init (mirrors nn.Linear default + binarization)
# ----------------------------------------------------------------------------
def init_binary_params(key, layers):
    weights, biases, offsets = [], [], []
    for i in range(len(layers) - 1):
        fan_in = layers[i + 1]
        bound = 1.0 / np.sqrt(fan_in)
        key, kw, kb = jax.random.split(key, 3)
        w = jax.random.uniform(kw, (layers[i], layers[i + 1]),
                               minval=-bound, maxval=bound, dtype=jnp.float32)
        # weightOffset = round(||W||_1 / numel, 4);  W <- sign(W) * offset
        offset = round(float(jnp.mean(jnp.abs(w))), 4)
        w = jnp.sign(w) * offset
        b = jax.random.uniform(kb, (layers[i],),
                               minval=-bound, maxval=bound, dtype=jnp.float32)
        weights.append(w)
        biases.append(b)
        offsets.append(offset)
    return weights, biases, offsets


def init_hidden(layers, data):
    batch = data.shape[0]
    state = [jnp.zeros((batch, layers[l]), jnp.float32) for l in range(len(layers))]
    state[-1] = data.astype(jnp.float32)
    return state


# ----------------------------------------------------------------------------
# Pure numpy reference (mirrors the PyTorch stepper/forward exactly)
# ----------------------------------------------------------------------------
def reference_forward(weights, biases, s, num_steps, beta=0.0, target=None):
    s = [np.asarray(x, np.float32) for x in s]
    W = [np.asarray(w, np.float32) for w in weights]
    B = [np.asarray(b, np.float32) for b in biases]
    tgt = None if target is None else np.asarray(target, np.float32)
    rho = lambda x: np.clip(x, 0.0, 1.0)
    for _ in range(num_steps):
        dsdt = [rho(s[1] @ W[0].T + B[0])]
        if beta != 0.0:
            dsdt[0] = dsdt[0] + beta * (tgt - s[0])
        for i in range(1, len(s) - 1):
            dsdt.append(rho(s[i + 1] @ W[i].T + B[i] + s[i - 1] @ W[i - 1]))
        for i in range(len(s) - 1):
            s[i] = np.clip(dsdt[i], 0.0, 1.0)
    return s


# ----------------------------------------------------------------------------
if __name__ == "__main__":
    # small architecture: layersList = [output, hidden, input]
    layers = [10, 32, 64]
    batch = 8
    T, Kmax, beta = 6, 3, 0.5

    key = jax.random.PRNGKey(0)
    key, kdata, ktgt, kparam = jax.random.split(key, 4)

    data = jax.random.uniform(kdata, (batch, layers[-1]), dtype=jnp.float32)
    target = jax.random.uniform(ktgt, (batch, layers[0]), dtype=jnp.float32)

    weights, biases, offsets = init_binary_params(kparam, layers)

    # padded / transposed / K-fused weights are prepared ONCE and reused
    params = prepare_params(layers, weights, biases, dtype=jnp.float32)

    # ---- free phase: forward(beta=0) -> T steps ------------------------------
    s0 = init_hidden(layers, data)
    s_free = relax_forward(layers, params, s0, num_steps=T, beta=0.0)
    jax.block_until_ready(s_free[0])

    # ---- nudged phase: forward(beta!=0, target) -> Kmax steps ----------------
    s_nudge = relax_forward(layers, params, [x for x in s_free],
                            num_steps=Kmax, beta=beta, target=target)
    jax.block_until_ready(s_nudge[0])

    # ---- check against the PyTorch-equivalent reference ----------------------
    ref_free = reference_forward(weights, biases, s0, T, beta=0.0)
    ref_nudge = reference_forward(weights, biases, ref_free, Kmax,
                                  beta=beta, target=target)

    for got, ref in zip(s_free[:-1], ref_free[:-1]):
        np.testing.assert_allclose(np.asarray(got), ref, rtol=1e-3, atol=1e-3)
    for got, ref in zip(s_nudge[:-1], ref_nudge[:-1]):
        np.testing.assert_allclose(np.asarray(got), ref, rtol=1e-3, atol=1e-3)

    print("KERNEL_OK")
</pallas_src>

<mosaic_0001>
module attributes {stable_mosaic.version = 11 : i64} {
  func.func @kernel(%arg0: i32, %arg1: memref<8x128xf32, #tpu.memory_space<vmem>>, %arg2: memref<8x128xf32, #tpu.memory_space<vmem>>, %arg3: memref<8x128xf32, #tpu.memory_space<vmem>>, %arg4: memref<128x128xf32, #tpu.memory_space<vmem>>, %arg5: memref<256x128xf32, #tpu.memory_space<vmem>>, %arg6: memref<1x128xf32, #tpu.memory_space<vmem>>, %arg7: memref<1x128xf32, #tpu.memory_space<vmem>>, %arg8: memref<8x128xf32, #tpu.memory_space<vmem>>, %arg9: memref<8x128xf32, #tpu.memory_space<vmem>>) attributes {dimension_semantics = [#tpu.dimension_semantics<parallel>], iteration_bounds = array<i64: 1>, scalar_prefetch = 0 : i64, scratch_operands = 0 : i64, tpu.core_type = #tpu.core_type<tc>, window_params = [{transform_indices = @transform_0, window_bounds = array<i64: 8, 128>}, {transform_indices = @transform_1, window_bounds = array<i64: 8, 128>}, {transform_indices = @transform_2, window_bounds = array<i64: 8, 128>}, {pipeline_mode = #tpu.pipeline_mode<synchronous>, transform_indices = @transform_3, window_bounds = array<i64: 128, 128>}, {pipeline_mode = #tpu.pipeline_mode<synchronous>, transform_indices = @transform_4, window_bounds = array<i64: 256, 128>}, {pipeline_mode = #tpu.pipeline_mode<synchronous>, transform_indices = @transform_5, window_bounds = array<i64: 1, 128>}, {pipeline_mode = #tpu.pipeline_mode<synchronous>, transform_indices = @transform_6, window_bounds = array<i64: 1, 128>}, {transform_indices = @transform_7, window_bounds = array<i64: 8, 128>}, {transform_indices = @transform_8, window_bounds = array<i64: 8, 128>}]} {
    %c0 = arith.constant 0 : index
    %c0_0 = arith.constant 0 : index
    %0 = vector.load %arg3[%c0, %c0_0] : memref<8x128xf32, #tpu.memory_space<vmem>>, vector<8x128xf32>
    %c0_1 = arith.constant 0 : index
    %c0_2 = arith.constant 0 : index
    %1 = vector.load %arg4[%c0_1, %c0_2] : memref<128x128xf32, #tpu.memory_space<vmem>>, vector<128x128xf32>
    %c0_3 = arith.constant 0 : index
    %c0_4 = arith.constant 0 : index
    %2 = vector.load %arg5[%c0_3, %c0_4] : memref<256x128xf32, #tpu.memory_space<vmem>>, vector<256x128xf32>
    %c0_5 = arith.constant 0 : index
    %c0_6 = arith.constant 0 : index
    %3 = vector.load %arg6[%c0_5, %c0_6] : memref<1x128xf32, #tpu.memory_space<vmem>>, vector<1x128xf32>
    %4 = vector.shape_cast %3 : vector<1x128xf32> to vector<1x128xf32>
    %5 = vector.broadcast %4 : vector<1x128xf32> to vector<8x128xf32>
    %c0_7 = arith.constant 0 : index
    %c0_8 = arith.constant 0 : index
    %6 = vector.load %arg7[%c0_7, %c0_8] : memref<1x128xf32, #tpu.memory_space<vmem>>, vector<1x128xf32>
    %7 = vector.shape_cast %6 : vector<1x128xf32> to vector<1x128xf32>
    %8 = vector.broadcast %7 : vector<1x128xf32> to vector<8x128xf32>
    %c0_9 = arith.constant 0 : index
    %c0_10 = arith.constant 0 : index
    %9 = vector.load %arg1[%c0_9, %c0_10] : memref<8x128xf32, #tpu.memory_space<vmem>>, vector<8x128xf32>
    %c0_11 = arith.constant 0 : index
    %c0_12 = arith.constant 0 : index
    %10 = vector.load %arg2[%c0_11, %c0_12] : memref<8x128xf32, #tpu.memory_space<vmem>>, vector<8x128xf32>
    %c0_i32 = arith.constant 0 : i32
    %cst = arith.constant dense<0.000000e+00> : vector<8x128xf32>
    %11 = tpu.matmul %10, %1, %cst {dimension_numbers = #tpu.dot_dimension_numbers<[1], [0], [0], [1], [0, 0, 1, 1], [], []>} : vector<8x128xf32>, vector<128x128xf32>, vector<8x128xf32> -> vector<8x128xf32>
    %12 = arith.addf %11, %5 : vector<8x128xf32>
    %cst_13 = arith.constant 0.000000e+00 : f32
    %cst_14 = arith.constant 1.000000e+00 : f32
    %13 = vector.broadcast %cst_13 : f32 to vector<8x128xf32>
    %14 = arith.maximumf %13, %12 : vector<8x128xf32>
    %15 = vector.broadcast %cst_14 : f32 to vector<8x128xf32>
    %16 = arith.minimumf %15, %14 : vector<8x128xf32>
    %17 = tpu.concatenate %0, %9 in 1 : vector<8x128xf32>, vector<8x128xf32> -> vector<8x256xf32>
    %cst_15 = arith.constant dense<0.000000e+00> : vector<8x128xf32>
    %18 = tpu.matmul %17, %2, %cst_15 {dimension_numbers = #tpu.dot_dimension_numbers<[1], [0], [0], [1], [0, 0, 1, 1], [], []>} : vector<8x256xf32>, vector<256x128xf32>, vector<8x128xf32> -> vector<8x128xf32>
    %19 = arith.addf %18, %8 : vector<8x128xf32>
    %cst_16 = arith.constant 0.000000e+00 : f32
    %cst_17 = arith.constant 1.000000e+00 : f32
    %20 = vector.broadcast %cst_16 : f32 to vector<8x128xf32>
    %21 = arith.maximumf %20, %19 : vector<8x128xf32>
    %22 = vector.broadcast %cst_17 : f32 to vector<8x128xf32>
    %23 = arith.minimumf %22, %21 : vector<8x128xf32>
    %c1_i32 = arith.constant 1 : i32
    %cst_18 = arith.constant dense<0.000000e+00> : vector<8x128xf32>
    %24 = tpu.matmul %23, %1, %cst_18 {dimension_numbers = #tpu.dot_dimension_numbers<[1], [0], [0], [1], [0, 0, 1, 1], [], []>} : vector<8x128xf32>, vector<128x128xf32>, vector<8x128xf32> -> vector<8x128xf32>
    %25 = arith.addf %24, %5 : vector<8x128xf32>
    %cst_19 = arith.constant 0.000000e+00 : f32
    %cst_20 = arith.constant 1.000000e+00 : f32
    %26 = vector.broadcast %cst_19 : f32 to vector<8x128xf32>
    %27 = arith.maximumf %26, %25 : vector<8x128xf32>
    %28 = vector.broadcast %cst_20 : f32 to vector<8x128xf32>
    %29 = arith.minimumf %28, %27 : vector<8x128xf32>
    %30 = tpu.concatenate %0, %16 in 1 : vector<8x128xf32>, vector<8x128xf32> -> vector<8x256xf32>
    %cst_21 = arith.constant dense<0.000000e+00> : vector<8x128xf32>
    %31 = tpu.matmul %30, %2, %cst_21 {dimension_numbers = #tpu.dot_dimension_numbers<[1], [0], [0], [1], [0, 0, 1, 1], [], []>} : vector<8x256xf32>, vector<256x128xf32>, vector<8x128xf32> -> vector<8x128xf32>
    %32 = arith.addf %31, %8 : vector<8x128xf32>
    %cst_22 = arith.constant 0.000000e+00 : f32
    %cst_23 = arith.constant 1.000000e+00 : f32
    %33 = vector.broadcast %cst_22 : f32 to vector<8x128xf32>
    %34 = arith.maximumf %33, %32 : vector<8x128xf32>
    %35 = vector.broadcast %cst_23 : f32 to vector<8x128xf32>
    %36 = arith.minimumf %35, %34 : vector<8x128xf32>
    %c2_i32 = arith.constant 2 : i32
    %cst_24 = arith.constant dense<0.000000e+00> : vector<8x128xf32>
    %37 = tpu.matmul %36, %1, %cst_24 {dimension_numbers = #tpu.dot_dimension_numbers<[1], [0], [0], [1], [0, 0, 1, 1], [], []>} : vector<8x128xf32>, vector<128x128xf32>, vector<8x128xf32> -> vector<8x128xf32>
    %38 = arith.addf %37, %5 : vector<8x128xf32>
    %cst_25 = arith.constant 0.000000e+00 : f32
    %cst_26 = arith.constant 1.000000e+00 : f32
    %39 = vector.broadcast %cst_25 : f32 to vector<8x128xf32>
    %40 = arith.maximumf %39, %38 : vector<8x128xf32>
    %41 = vector.broadcast %cst_26 : f32 to vector<8x128xf32>
    %42 = arith.minimumf %41, %40 : vector<8x128xf32>
    %43 = tpu.concatenate %0, %29 in 1 : vector<8x128xf32>, vector<8x128xf32> -> vector<8x256xf32>
    %cst_27 = arith.constant dense<0.000000e+00> : vector<8x128xf32>
    %44 = tpu.matmul %43, %2, %cst_27 {dimension_numbers = #tpu.dot_dimension_numbers<[1], [0], [0], [1], [0, 0, 1, 1], [], []>} : vector<8x256xf32>, vector<256x128xf32>, vector<8x128xf32> -> vector<8x128xf32>
    %45 = arith.addf %44, %8 : vector<8x128xf32>
    %cst_28 = arith.constant 0.000000e+00 : f32
    %cst_29 = arith.constant 1.000000e+00 : f32
    %46 = vector.broadcast %cst_28 : f32 to vector<8x128xf32>
    %47 = arith.maximumf %46, %45 : vector<8x128xf32>
    %48 = vector.broadcast %cst_29 : f32 to vector<8x128xf32>
    %49 = arith.minimumf %48, %47 : vector<8x128xf32>
    %c3_i32 = arith.constant 3 : i32
    %cst_30 = arith.constant dense<0.000000e+00> : vector<8x128xf32>
    %50 = tpu.matmul %49, %1, %cst_30 {dimension_numbers = #tpu.dot_dimension_numbers<[1], [0], [0], [1], [0, 0, 1, 1], [], []>} : vector<8x128xf32>, vector<128x128xf32>, vector<8x128xf32> -> vector<8x128xf32>
    %51 = arith.addf %50, %5 : vector<8x128xf32>
    %cst_31 = arith.constant 0.000000e+00 : f32
    %cst_32 = arith.constant 1.000000e+00 : f32
    %52 = vector.broadcast %cst_31 : f32 to vector<8x128xf32>
    %53 = arith.maximumf %52, %51 : vector<8x128xf32>
    %54 = vector.broadcast %cst_32 : f32 to vector<8x128xf32>
    %55 = arith.minimumf %54, %53 : vector<8x128xf32>
    %56 = tpu.concatenate %0, %42 in 1 : vector<8x128xf32>, vector<8x128xf32> -> vector<8x256xf32>
    %cst_33 = arith.constant dense<0.000000e+00> : vector<8x128xf32>
    %57 = tpu.matmul %56, %2, %cst_33 {dimension_numbers = #tpu.dot_dimension_numbers<[1], [0], [0], [1], [0, 0, 1, 1], [], []>} : vector<8x256xf32>, vector<256x128xf32>, vector<8x128xf32> -> vector<8x128xf32>
    %58 = arith.addf %57, %8 : vector<8x128xf32>
    %cst_34 = arith.constant 0.000000e+00 : f32
    %cst_35 = arith.constant 1.000000e+00 : f32
    %59 = vector.broadcast %cst_34 : f32 to vector<8x128xf32>
    %60 = arith.maximumf %59, %58 : vector<8x128xf32>
    %61 = vector.broadcast %cst_35 : f32 to vector<8x128xf32>
    %62 = arith.minimumf %61, %60 : vector<8x128xf32>
    %c4_i32 = arith.constant 4 : i32
    %cst_36 = arith.constant dense<0.000000e+00> : vector<8x128xf32>
    %63 = tpu.matmul %62, %1, %cst_36 {dimension_numbers = #tpu.dot_dimension_numbers<[1], [0], [0], [1], [0, 0, 1, 1], [], []>} : vector<8x128xf32>, vector<128x128xf32>, vector<8x128xf32> -> vector<8x128xf32>
    %64 = arith.addf %63, %5 : vector<8x128xf32>
    %cst_37 = arith.constant 0.000000e+00 : f32
    %cst_38 = arith.constant 1.000000e+00 : f32
    %65 = vector.broadcast %cst_37 : f32 to vector<8x128xf32>
    %66 = arith.maximumf %65, %64 : vector<8x128xf32>
    %67 = vector.broadcast %cst_38 : f32 to vector<8x128xf32>
    %68 = arith.minimumf %67, %66 : vector<8x128xf32>
    %69 = tpu.concatenate %0, %55 in 1 : vector<8x128xf32>, vector<8x128xf32> -> vector<8x256xf32>
    %cst_39 = arith.constant dense<0.000000e+00> : vector<8x128xf32>
    %70 = tpu.matmul %69, %2, %cst_39 {dimension_numbers = #tpu.dot_dimension_numbers<[1], [0], [0], [1], [0, 0, 1, 1], [], []>} : vector<8x256xf32>, vector<256x128xf32>, vector<8x128xf32> -> vector<8x128xf32>
    %71 = arith.addf %70, %8 : vector<8x128xf32>
    %cst_40 = arith.constant 0.000000e+00 : f32
    %cst_41 = arith.constant 1.000000e+00 : f32
    %72 = vector.broadcast %cst_40 : f32 to vector<8x128xf32>
    %73 = arith.maximumf %72, %71 : vector<8x128xf32>
    %74 = vector.broadcast %cst_41 : f32 to vector<8x128xf32>
    %75 = arith.minimumf %74, %73 : vector<8x128xf32>
    %c5_i32 = arith.constant 5 : i32
    %cst_42 = arith.constant dense<0.000000e+00> : vector<8x128xf32>
    %76 = tpu.matmul %75, %1, %cst_42 {dimension_numbers = #tpu.dot_dimension_numbers<[1], [0], [0], [1], [0, 0, 1, 1], [], []>} : vector<8x128xf32>, vector<128x128xf32>, vector<8x128xf32> -> vector<8x128xf32>
    %77 = arith.addf %76, %5 : vector<8x128xf32>
    %cst_43 = arith.constant 0.000000e+00 : f32
    %cst_44 = arith.constant 1.000000e+00 : f32
    %78 = vector.broadcast %cst_43 : f32 to vector<8x128xf32>
    %79 = arith.maximumf %78, %77 : vector<8x128xf32>
    %80 = vector.broadcast %cst_44 : f32 to vector<8x128xf32>
    %81 = arith.minimumf %80, %79 : vector<8x128xf32>
    %82 = tpu.concatenate %0, %68 in 1 : vector<8x128xf32>, vector<8x128xf32> -> vector<8x256xf32>
    %cst_45 = arith.constant dense<0.000000e+00> : vector<8x128xf32>
    %83 = tpu.matmul %82, %2, %cst_45 {dimension_numbers = #tpu.dot_dimension_numbers<[1], [0], [0], [1], [0, 0, 1, 1], [], []>} : vector<8x256xf32>, vector<256x128xf32>, vector<8x128xf32> -> vector<8x128xf32>
    %84 = arith.addf %83, %8 : vector<8x128xf32>
    %cst_46 = arith.constant 0.000000e+00 : f32
    %cst_47 = arith.constant 1.000000e+00 : f32
    %85 = vector.broadcast %cst_46 : f32 to vector<8x128xf32>
    %86 = arith.maximumf %85, %84 : vector<8x128xf32>
    %87 = vector.broadcast %cst_47 : f32 to vector<8x128xf32>
    %88 = arith.minimumf %87, %86 : vector<8x128xf32>
    %c0_48 = arith.constant 0 : index
    %c0_49 = arith.constant 0 : index
    %89 = vector.load %arg8[%c0_48, %c0_49] : memref<8x128xf32, #tpu.memory_space<vmem>>, vector<8x128xf32>
    tpu.vector_store %arg8[%c0_48, %c0_49], %81 {strides = array<i32>} : memref<8x128xf32, #tpu.memory_space<vmem>>, vector<8x128xf32>,
    %c0_50 = arith.constant 0 : index
    %c0_51 = arith.constant 0 : index
    %90 = vector.load %arg9[%c0_50, %c0_51] : memref<8x128xf32, #tpu.memory_space<vmem>>, vector<8x128xf32>
    tpu.vector_store %arg9[%c0_50, %c0_51], %88 {strides = array<i32>} : memref<8x128xf32, #tpu.memory_space<vmem>>, vector<8x128xf32>,
    return
  }
  func.func @transform_0(%arg0: i32) -> (i32, i32) {
    %c0_i32 = arith.constant 0 : i32
    %c0_i32_0 = arith.constant 0 : i32
    return %arg0, %c0_i32 : i32, i32
  }
  func.func @transform_1(%arg0: i32) -> (i32, i32) {
    %c0_i32 = arith.constant 0 : i32
    %c0_i32_0 = arith.constant 0 : i32
    return %arg0, %c0_i32 : i32, i32
  }
  func.func @transform_2(%arg0: i32) -> (i32, i32) {
    %c0_i32 = arith.constant 0 : i32
    %c0_i32_0 = arith.constant 0 : i32
    return %arg0, %c0_i32 : i32, i32
  }
  func.func @transform_3(%arg0: i32) -> (i32, i32) {
    %c0_i32 = arith.constant 0 : i32
    %c0_i32_0 = arith.constant 0 : i32
    %c0_i32_1 = arith.constant 0 : i32
    return %c0_i32, %c0_i32_0 : i32, i32
  }
  func.func @transform_4(%arg0: i32) -> (i32, i32) {
    %c0_i32 = arith.constant 0 : i32
    %c0_i32_0 = arith.constant 0 : i32
    %c0_i32_1 = arith.constant 0 : i32
    return %c0_i32, %c0_i32_0 : i32, i32
  }
  func.func @transform_5(%arg0: i32) -> (i32, i32) {
    %c0_i32 = arith.constant 0 : i32
    %c0_i32_0 = arith.constant 0 : i32
    %c0_i32_1 = arith.constant 0 : i32
    return %c0_i32, %c0_i32_0 : i32, i32
  }
  func.func @transform_6(%arg0: i32) -> (i32, i32) {
    %c0_i32 = arith.constant 0 : i32
    %c0_i32_0 = arith.constant 0 : i32
    %c0_i32_1 = arith.constant 0 : i32
    return %c0_i32, %c0_i32_0 : i32, i32
  }
  func.func @transform_7(%arg0: i32) -> (i32, i32) {
    %c0_i32 = arith.constant 0 : i32
    %c0_i32_0 = arith.constant 0 : i32
    return %arg0, %c0_i32 : i32, i32
  }
  func.func @transform_8(%arg0: i32) -> (i32, i32) {
    %c0_i32 = arith.constant 0 : i32
    %c0_i32_0 = arith.constant 0 : i32
    return %arg0, %c0_i32 : i32, i32
  }
}

</mosaic_0001>

<bundles_post_ra>
// kernel: tpu_custom_call.1
= control target key start
LH: loop header
LB: loop body
LE: loop exit
PB: predicated region body
PF: predicated region fallthrough
CT: control target
= control target key end

     0   :  { %14 = vsyncpa [#allocation3], 0  ;;  %s2305_s0 = inlined_call_operand.hbm [shape: f32[8,128], index: 0, kind: input, shape index: {}, may-alias: {0,7}]   ;;  %s2306_s1 = inlined_call_operand.hbm [shape: f32[8,128], index: 1, kind: input, shape index: {}, may-alias: {1,8}]   ;;  %s2307_s2 = inlined_call_operand.vmem [shape: f32[8,128], index: 2, kind: input, shape index: {}]   ;;  %s2308_s3 = inlined_call_operand.hbm [shape: f32[128,128], index: 3, kind: input, shape index: {}]   ;;  %s2309_s4 = inlined_call_operand.hbm [shape: f32[256,128], index: 4, kind: input, shape index: {}]   ;;  %s2310_s5 = inlined_call_operand.vmem [shape: f32[1,128], index: 5, kind: input, shape index: {}]   ;;  %s2311_s6 = inlined_call_operand.vmem [shape: f32[1,128], index: 6, kind: input, shape index: {}]   ;;  %s2312_s7 = inlined_call_operand.hbm [shape: f32[8,128], index: 7, kind: output, shape index: {0}, may-alias: {0,7}]   ;;  %s2313_s8 = inlined_call_operand.hbm [shape: f32[8,128], index: 8, kind: output, shape index: {1}, may-alias: {1,8}]  }
   0x1   :  { %15 = vsyncpa [#allocation6], 0 }
   0x2   :  { %16 = vsyncpa [#allocation9], 0 }
   0x3   :  { %17 = vsyncpa [#allocation4], 0 }
   0x4   :  { %18 = vsyncpa [#allocation12], 0  ;;  %s1707_s27 = smov [#allocation5]   ;;  %s1708_s29 = smov [#allocation2]  }
   0x5   :  { %s35_s28 = sshll.u32 %s1707_s27, 4  ;;  %s25_s30 = sshll.u32 %s1708_s29, 4  ;;  %s36_s28 = int_to_ptr.vmem [resolvable:$true] %s35_s28  ;;  %s26_s30 = int_to_ptr.vmem [resolvable:$true] %s25_s30 }
   0x6   :  { %s1585_s9 = scalar_lea.vmem %s36_s28, 128  ;;  %p1590_p1 = scmp.lt.s32.totalorder %s36_s28, %s36_s28 }
   0x7   :  { %p1586_p0 = scmp.ne.s32.totalorder %s36_s28, %s1585_s9  ;;  %p1591_p2 = scmp.lt.s32.totalorder %s1585_s9, %s1585_s9 }
   0x9   :  { %p1592_p3 = por %p1591_p2, %p1590_p1 }
   0xb   :  { %p1593_p4 = pnand %p1592_p3, %p1586_p0 }
   0xd   :  { %1596 = shalt.err (!%p1593_p4)
}
   0xe   :  { %38 = dma.hbm_to_vmem [thread:$0]  %s2306_s1, 128, %s36_s28, [#allocation6]  }
   0xf   :  { %s1605_s12 = scalar_lea.vmem %s26_s30, 128  ;;  %p1610_p6 = scmp.lt.s32.totalorder %s26_s30, %s26_s30 }
  0x10   :  { %p1606_p5 = scmp.ne.s32.totalorder %s26_s30, %s1605_s12  ;;  %p1611_p7 = scmp.lt.s32.totalorder %s1605_s12, %s1605_s12 }
  0x12   :  { %p1612_p8 = por %p1611_p7, %p1610_p6 }
  0x14   :  { %p1613_p9 = pnand %p1612_p8, %p1606_p5 }
  0x16   :  { %1616 = shalt.err (!%p1613_p9)
}
  0x17   :  { %28 = dma.hbm_to_vmem [thread:$0]  %s2305_s0, 128, %s26_s30, [#allocation3]  }
  0x18   :  { %s1709_s15 = smov [#allocation7]  }
  0x19   :  { %s46_s16 = sshll.u32 %s1709_s15, 4  ;;  %s47_s16 = int_to_ptr.vmem [resolvable:$true] %s46_s16 }
  0x1a   :  { %s1625_s17 = scalar_lea.vmem %s47_s16, 2048  ;;  %p1630_p11 = scmp.lt.s32.totalorder %s47_s16, %s47_s16 }
  0x1b   :  { %p1626_p10 = scmp.ne.s32.totalorder %s47_s16, %s1625_s17  ;;  %p1631_p12 = scmp.lt.s32.totalorder %s1625_s17, %s1625_s17 }
  0x1d   :  { %p1632_p13 = por %p1631_p12, %p1630_p11 }
  0x1f   :  { %p1633_p0 = pnand %p1632_p13, %p1626_p10 }
  0x21   :  { %1636 = shalt.err (!%p1633_p0)
}
  0x22   :  { %s1710_s1 = smov 128   ;;  %s1711_s18 = smov 8  }
  0x23   :  { %52 = dma.hbm_to_vmem [thread:$0]  %s2308_s3, 2048, %s47_s16, [#allocation6], %s1710_s1, %s1710_s1, %s1711_s18  }
  0x24   :  { %s1712_s21 = smov [#allocation8]  }
  0x25   :  { %s58_s22 = sshll.u32 %s1712_s21, 4  ;;  %s59_s22 = int_to_ptr.vmem [resolvable:$true] %s58_s22 }
  0x26   :  { %s1645_s0 = scalar_lea.vmem %s59_s22, 4096  ;;  %p1650_p2 = scmp.lt.s32.totalorder %s59_s22, %s59_s22 }
  0x27   :  { %p1646_p1 = scmp.ne.s32.totalorder %s59_s22, %s1645_s0  ;;  %p1651_p3 = scmp.lt.s32.totalorder %s1645_s0, %s1645_s0 }
  0x29   :  { %p1652_p4 = por %p1651_p3, %p1650_p2 }
  0x2b   :  { %p1653_p5 = pnand %p1652_p4, %p1646_p1 }
  0x2d   :  { %1656 = shalt.err (!%p1653_p5)
}
  0x2e   :  { %64 = dma.hbm_to_vmem [thread:$0]  %s2309_s4, 4096, %s59_s22, [#allocation9], %s1710_s1, %s1710_s1, %s1711_s18  }
  0x2f   :  { %1697 = dma.done.wait [#allocation3], 128  }
  0x30   :  { %1698 = vsyncadd [#allocation3], 4294967168 }
  0x31   :  { %1699 = dma.done.wait [#allocation6], 2176  }
  0x32   :  { %1700 = vsyncadd [#allocation6], 4294965120 }
  0x33   :  { %1701 = dma.done.wait [#allocation9], 4096  }
  0x34   :  { %1702 = vsyncadd [#allocation9], 4294963200  ;;  %v1713_v0 = vmov 0.0   ;;  %vm1714_vm0 = vmmov 0   ;;  %v1777_v1 = vld [vmem:[#allocation7 + $0x78] sm:$0xff]  ;;  %v1785_v4 = vld [vmem:[#allocation7 + $0x70] sm:$0xff] }
  0x35   :  { %1357 = vmatprep.subr.mxu0 %v1713_v0  ;;  %1389 = vmatprep.mubr.msk.f32.mxu0 %vm1714_vm0, %v1713_v0  ;;  %v1779_v2 = vld [vmem:[#allocation8 + $0xf8] sm:$0xff]  ;;  %v1787_v5 = vld [vmem:[#allocation8 + $0xf0] sm:$0xff]  ;;  %v1793_v7 = vld [vmem:[#allocation7 + $0x68] sm:$0xff]  ;;  %s1716_s28 = smov [#allocation10]  }
  0x36   :  { %v1781_v3 = vld [vmem:[#allocation8 + $0x78] sm:$0xff]  ;;  %1358 = vmatpush3.msra.mxu0 %v1777_v1  ;;  %1062 = vmatprep.subr.mxu1 %v1779_v2  ;;  %v1789_v6 = vld [vmem:[#allocation8 + $0x70] sm:$0xff]  ;;  %v1795_v8 = vld [vmem:[#allocation8 + $0xe8] sm:$0xff]  ;;  %s1018_s29 = sshll.u32 %s1716_s28, 4  ;;  %s1019_s29 = int_to_ptr.vmem [resolvable:$true] %s1018_s29 }
  0x37   :  { %1359 = vmatprep.subr.mxu0 %v1713_v0  ;;  %1063 = vmatpush3.msra.mxu1 %v1781_v3  ;;  %v1799_v9 = vld [vmem:[#allocation8 + $0x68] sm:$0xff]  ;;  %v1803_v10 = vld [vmem:[#allocation7 + $0x60] sm:$0xff]  ;;  %v1813_v13 = vld [vmem:[#allocation7 + $0x58] sm:$0xff] }
  0x38   :  { %1360 = vmatpush3.msra.mxu0 %v1785_v4  ;;  %1064 = vmatprep.subr.mxu1 %v1787_v5  ;;  %v1805_v11 = vld [vmem:[#allocation8 + $0xe0] sm:$0xff]  ;;  %v1815_v14 = vld [vmem:[#allocation8 + $0xd8] sm:$0xff]  ;;  %v1823_v16 = vld [vmem:[#allocation7 + $0x50] sm:$0xff] }
  0x39   :  { %1361 = vmatprep.subr.mxu0 %v1713_v0  ;;  %1065 = vmatpush3.msra.mxu1 %v1789_v6  ;;  %v1809_v12 = vld [vmem:[#allocation8 + $0x60] sm:$0xff]  ;;  %v1819_v15 = vld [vmem:[#allocation8 + $0x58] sm:$0xff]  ;;  %v1825_v17 = vld [vmem:[#allocation8 + $0xd0] sm:$0xff] }
  0x3a   :  { %1362 = vmatpush3.msra.mxu0 %v1793_v7  ;;  %1066 = vmatprep.subr.mxu1 %v1795_v8  ;;  %v1829_v18 = vld [vmem:[#allocation8 + $0x50] sm:$0xff]  ;;  %v1833_v19 = vld [vmem:[#allocation7 + $0x48] sm:$0xff]  ;;  %v1843_v22 = vld [vmem:[#allocation7 + $0x40] sm:$0xff] }
  0x3b   :  { %1363 = vmatprep.subr.mxu0 %v1713_v0  ;;  %1067 = vmatpush3.msra.mxu1 %v1799_v9  ;;  %v1835_v20 = vld [vmem:[#allocation8 + $0xc8] sm:$0xff]  ;;  %v1845_v23 = vld [vmem:[#allocation8 + $0xc0] sm:$0xff]  ;;  %v1853_v25 = vld [vmem:[#allocation7 + $0x38] sm:$0xff] }
  0x3c   :  { %1364 = vmatpush3.msra.mxu0 %v1803_v10  ;;  %1068 = vmatprep.subr.mxu1 %v1805_v11  ;;  %v1839_v21 = vld [vmem:[#allocation8 + $0x48] sm:$0xff]  ;;  %v1849_v24 = vld [vmem:[#allocation8 + $0x40] sm:$0xff]  ;;  %v1855_v26 = vld [vmem:[#allocation8 + $0xb8] sm:$0xff] }
  0x3d   :  { %1365 = vmatprep.subr.mxu0 %v1713_v0  ;;  %1069 = vmatpush3.msra.mxu1 %v1809_v12  ;;  %v1859_v27 = vld [vmem:[#allocation8 + $0x38] sm:$0xff]  ;;  %v1863_v28 = vld [vmem:[#allocation7 + $0x30] sm:$0xff]  ;;  %v1873_v31 = vld [vmem:[#allocation7 + $0x28] sm:$0xff] }
  0x3e   :  { %1366 = vmatpush3.msra.mxu0 %v1813_v13  ;;  %1070 = vmatprep.subr.mxu1 %v1815_v14  ;;  %v1865_v29 = vld [vmem:[#allocation8 + $0xb0] sm:$0xff]  ;;  %v1875_v32 = vld [vmem:[#allocation8 + $0xa8] sm:$0xff]  ;;  %v1883_v34 = vld [vmem:[#allocation7 + $0x20] sm:$0xff] }
  0x3f   :  { %1367 = vmatprep.subr.mxu0 %v1713_v0  ;;  %1071 = vmatpush3.msra.mxu1 %v1819_v15  ;;  %v1869_v30 = vld [vmem:[#allocation8 + $0x30] sm:$0xff]  ;;  %v1879_v33 = vld [vmem:[#allocation8 + $0x28] sm:$0xff]  ;;  %v1885_v35 = vld [vmem:[#allocation8 + $0xa0] sm:$0xff] }
  0x40   :  { %1368 = vmatpush3.msra.mxu0 %v1823_v16  ;;  %1072 = vmatprep.subr.mxu1 %v1825_v17  ;;  %v1889_v36 = vld [vmem:[#allocation8 + $0x20] sm:$0xff]  ;;  %v1893_v37 = vld [vmem:[#allocation7 + $0x18] sm:$0xff]  ;;  %v1903_v40 = vld [vmem:[#allocation7 + $0x10] sm:$0xff] }
  0x41   :  { %1369 = vmatprep.subr.mxu0 %v1713_v0  ;;  %1073 = vmatpush3.msra.mxu1 %v1829_v18  ;;  %v1895_v38 = vld [vmem:[#allocation8 + $0x98] sm:$0xff]  ;;  %v1905_v41 = vld [vmem:[#allocation8 + $0x90] sm:$0xff]  ;;  %v1913_v43 = vld [vmem:[#allocation7 + $0x8] sm:$0xff] }
  0x42   :  { %1370 = vmatpush3.msra.mxu0 %v1833_v19  ;;  %1074 = vmatprep.subr.mxu1 %v1835_v20  ;;  %v1899_v39 = vld [vmem:[#allocation8 + $0x18] sm:$0xff]  ;;  %v1909_v42 = vld [vmem:[#allocation8 + $0x10] sm:$0xff]  ;;  %v1915_v44 = vld [vmem:[#allocation8 + $0x88] sm:$0xff] }
  0x43   :  { %1371 = vmatprep.subr.mxu0 %v1713_v0  ;;  %1075 = vmatpush3.msra.mxu1 %v1839_v21  ;;  %v1919_v45 = vld [vmem:[#allocation8 + $0x8] sm:$0xff]  ;;  %v1923_v46 = vld [vmem:[#allocation7] sm:$0xff]  ;;  %v145_v48 = vld [vmem:[#allocation5] sm:$0xff] }
  0x44   :  { %1372 = vmatpush3.msra.mxu0 %v1843_v22  ;;  %1076 = vmatprep.subr.mxu1 %v1845_v23  ;;  %v1925_v47 = vld [vmem:[#allocation8 + $0x80] sm:$0xff]  ;;  %v144_v50 = vld [vmem:[#allocation2] sm:$0xff] }
  0x45   :  { %1373 = vmatprep.subr.mxu0 %v1713_v0  ;;  %1077 = vmatpush3.msra.mxu1 %v1849_v24  ;;  %v1929_v49 = vld [vmem:[#allocation8] sm:$0xff]  ;;  %v1938_v51 = vld [vmem:[%s2307_s2] sm:$0xff] }
  0x46   :  { %1374 = vmatpush3.msra.mxu0 %v1853_v25  ;;  %1078 = vmatprep.subr.mxu1 %v1855_v26  ;;  %v2013_v52 = vld [vmem:[%s2310_s5] ss:$0 sm:$0xff]  ;;  %s1715_s5 = smov [#allocation11]  }
  0x47   :  { %1375 = vmatprep.subr.mxu0 %v1713_v0  ;;  %1079 = vmatpush3.msra.mxu1 %v1859_v27  ;;  %v2019_v58 = vld [vmem:[%s2311_s6] ss:$0 sm:$0xff]  ;;  %s1028_s6 = sshll.u32 %s1715_s5, 4  ;;  %s1029_s6 = int_to_ptr.vmem [resolvable:$true] %s1028_s6 }
  0x48   :  { %1376 = vmatpush3.msra.mxu0 %v1863_v28  ;;  %1080 = vmatprep.subr.mxu1 %v1865_v29  ;;  %s1657_s30 = scalar_lea.vmem %s1029_s6, 128  ;;  %p1662_p7 = scmp.lt.s32.totalorder %s1029_s6, %s1029_s6 }
  0x49   :  { %1377 = vmatprep.subr.mxu0 %v1713_v0  ;;  %1081 = vmatpush3.msra.mxu1 %v1869_v30  ;;  %p1658_p6 = scmp.ne.s32.totalorder %s1029_s6, %s1657_s30  ;;  %p1663_p8 = scmp.lt.s32.totalorder %s1657_s30, %s1657_s30 }
  0x4a   :  { %1378 = vmatpush3.msra.mxu0 %v1873_v31  ;;  %1082 = vmatprep.subr.mxu1 %v1875_v32 }
  0x4b   :  { %1379 = vmatprep.subr.mxu0 %v1713_v0  ;;  %1083 = vmatpush3.msra.mxu1 %v1879_v33  ;;  %p1664_p9 = por %p1663_p8, %p1662_p7 }
  0x4c   :  { %1380 = vmatpush3.msra.mxu0 %v1883_v34  ;;  %1084 = vmatprep.subr.mxu1 %v1885_v35 }
  0x4d   :  { %1381 = vmatprep.subr.mxu0 %v1713_v0  ;;  %1085 = vmatpush3.msra.mxu1 %v1889_v36  ;;  %p1665_p10 = pnand %p1664_p9, %p1658_p6 }
  0x4e   :  { %1382 = vmatpush3.msra.mxu0 %v1893_v37  ;;  %1086 = vmatprep.subr.mxu1 %v1895_v38 }
  0x4f   :  { %1383 = vmatprep.subr.mxu0 %v1713_v0  ;;  %1087 = vmatpush3.msra.mxu1 %v1899_v39 }
  0x50   :  { %1384 = vmatpush3.msra.mxu0 %v1903_v40  ;;  %1088 = vmatprep.subr.mxu1 %v1905_v41 }
  0x51   :  { %1385 = vmatprep.subr.mxu0 %v1713_v0  ;;  %1089 = vmatpush3.msra.mxu1 %v1909_v42 }
  0x52   :  { %1386 = vmatpush3.msra.mxu0 %v1913_v43  ;;  %1090 = vmatprep.subr.mxu1 %v1915_v44 }
  0x53   :  { %1387 = vmatprep.subr.mxu0 %v1713_v0  ;;  %1091 = vmatpush3.msra.mxu1 %v1919_v45 }
  0x54   :  { %1388 = vmatpush3.msra.mxu0 %v1923_v46  ;;  %1092 = vmatprep.subr.mxu1 %v1925_v47 }
  0x55   :  { %1390 = vmatmul.mubr.f32.vlgmr.msra.gmra.mxu0 %v145_v48  ;;  %1093 = vmatpush3.msra.mxu1 %v1929_v49 }
  0x56   :  { %282 = vmatprep.mubr.f32.mxu1 %v144_v50  ;;  %1114 = vmatprep.subr.mxu1 %v1779_v2 }
  0x57   :  { %283 = vmatmul.mubr.f32.vlgmr.msra.gmra.mxu1 %v1938_v51  ;;  %1392 = vmatprep.subr.mxu0 %v1713_v0 }
  0x58   :  { %1115 = vmatpush3.msra.mxu1 %v1781_v3  ;;  %1393 = vmatpush3.msra.mxu0 %v1777_v1 }
  0x59   :  { %1116 = vmatprep.subr.mxu1 %v1787_v5  ;;  %1394 = vmatprep.subr.mxu0 %v1713_v0 }
  0x5a   :  { %1117 = vmatpush3.msra.mxu1 %v1789_v6  ;;  %1395 = vmatpush3.msra.mxu0 %v1785_v4 }
  0x5b   :  { %1118 = vmatprep.subr.mxu1 %v1795_v8  ;;  %1396 = vmatprep.subr.mxu0 %v1713_v0 }
  0x5c   :  { %1119 = vmatpush3.msra.mxu1 %v1799_v9  ;;  %1397 = vmatpush3.msra.mxu0 %v1793_v7 }
  0x5d   :  { %1120 = vmatprep.subr.mxu1 %v1805_v11  ;;  %1398 = vmatprep.subr.mxu0 %v1713_v0 }
  0x5e   :  { %1121 = vmatpush3.msra.mxu1 %v1809_v12  ;;  %1399 = vmatpush3.msra.mxu0 %v1803_v10 }
  0x5f   :  { %1122 = vmatprep.subr.mxu1 %v1815_v14  ;;  %1400 = vmatprep.subr.mxu0 %v1713_v0 }
  0x60   :  { %1123 = vmatpush3.msra.mxu1 %v1819_v15  ;;  %1401 = vmatpush3.msra.mxu0 %v1813_v13 }
  0x61   :  { %1124 = vmatprep.subr.mxu1 %v1825_v17  ;;  %1402 = vmatprep.subr.mxu0 %v1713_v0 }
  0x62   :  { %1125 = vmatpush3.msra.mxu1 %v1829_v18  ;;  %1403 = vmatpush3.msra.mxu0 %v1823_v16 }
  0x63   :  { %1126 = vmatprep.subr.mxu1 %v1835_v20  ;;  %1404 = vmatprep.subr.mxu0 %v1713_v0 }
  0x64   :  { %1127 = vmatpush3.msra.mxu1 %v1839_v21  ;;  %1405 = vmatpush3.msra.mxu0 %v1833_v19 }
  0x65   :  { %1128 = vmatprep.subr.mxu1 %v1845_v23  ;;  %1406 = vmatprep.subr.mxu0 %v1713_v0 }
  0x66   :  { %1129 = vmatpush3.msra.mxu1 %v1849_v24  ;;  %1407 = vmatpush3.msra.mxu0 %v1843_v22 }
  0x67   :  { %1130 = vmatprep.subr.mxu1 %v1855_v26  ;;  %1408 = vmatprep.subr.mxu0 %v1713_v0 }
  0x68   :  { %1131 = vmatpush3.msra.mxu1 %v1859_v27  ;;  %1409 = vmatpush3.msra.mxu0 %v1853_v25 }
  0x69   :  { %1132 = vmatprep.subr.mxu1 %v1865_v29  ;;  %1410 = vmatprep.subr.mxu0 %v1713_v0 }
  0x6a   :  { %1133 = vmatpush3.msra.mxu1 %v1869_v30  ;;  %1411 = vmatpush3.msra.mxu0 %v1863_v28 }
  0x6b   :  { %1134 = vmatprep.subr.mxu1 %v1875_v32  ;;  %1412 = vmatprep.subr.mxu0 %v1713_v0 }
  0x6c   :  { %1135 = vmatpush3.msra.mxu1 %v1879_v33  ;;  %1413 = vmatpush3.msra.mxu0 %v1873_v31 }
  0x6d   :  { %1136 = vmatprep.subr.mxu1 %v1885_v35  ;;  %1414 = vmatprep.subr.mxu0 %v1713_v0 }
  0x6e   :  { %1137 = vmatpush3.msra.mxu1 %v1889_v36  ;;  %1415 = vmatpush3.msra.mxu0 %v1883_v34 }
  0x6f   :  { %1138 = vmatprep.subr.mxu1 %v1895_v38  ;;  %1416 = vmatprep.subr.mxu0 %v1713_v0 }
  0x70   :  { %1139 = vmatpush3.msra.mxu1 %v1899_v39  ;;  %1417 = vmatpush3.msra.mxu0 %v1893_v37 }
  0x71   :  { %1140 = vmatprep.subr.mxu1 %v1905_v41  ;;  %1418 = vmatprep.subr.mxu0 %v1713_v0 }
  0x72   :  { %1141 = vmatpush3.msra.mxu1 %v1909_v42  ;;  %1419 = vmatpush3.msra.mxu0 %v1903_v40 }
  0x73   :  { %1142 = vmatprep.subr.mxu1 %v1915_v44  ;;  %1420 = vmatprep.subr.mxu0 %v1713_v0 }
  0x74   :  { %1143 = vmatpush3.msra.mxu1 %v1919_v45  ;;  %1421 = vmatpush3.msra.mxu0 %v1913_v43 }
  0x75   :  { %1144 = vmatprep.subr.mxu1 %v1925_v47  ;;  %1422 = vmatprep.subr.mxu0 %v1713_v0 }
  0x76   :  { %1145 = vmatpush3.msra.mxu1 %v1929_v49  ;;  %1423 = vmatpush3.msra.mxu0 %v1923_v46 }
  0x77   :  { %1424 = vmatprep.mubr.msk.f32.mxu0 %vm1714_vm0, %v1713_v0  ;;  %1427 = vmatprep.subr.mxu0 %v1713_v0 }
  0x78   :  { %1166 = vmatprep.subr.mxu1 %v1779_v2 }
 0x115   :  { %v212_v53 = vpop.f32.mrf.mxu0 }
 0x116   :  { %v213_v54 = vadd.f32 %v2013_v52, %v212_v53 }
 0x117   :  { %v1094_v55 = vpop.f32.mrf.mxu1  ;;  %v1391_v56 = vpop.f32.mrf.mxu0 }
 0x118   :  { %v216_v57 = vmax.f32 %v213_v54, 0.0 }
 0x119   :  { %v1095_v59 = vpop.f32.mrf.mxu1 }
 0x11a   :  { %v217_v60 = vmin.f32 %v216_v57, 1.0  ;;  %v1096_v61 = vadd.f32 %v1095_v59, %v1094_v55 }
 0x11c   :  { %v285_v62 = vadd.f32 %v1096_v61, %v2019_v58  ;;  %426 = vmatprep.mubr.f32.mxu1 %v217_v60 }
 0x11d   :  { %427 = vmatmul.mubr.f32.vlgmr.msra.gmra.mxu1 %v1938_v51 }
 0x11e   :  { %v288_v63 = vmax.f32 %v285_v62, 0.0  ;;  %1167 = vmatpush3.msra.mxu1 %v1781_v3 }
 0x11f   :  { %1168 = vmatprep.subr.mxu1 %v1787_v5 }
 0x120   :  { %v289_v48 = vmin.f32 %v288_v63, 1.0  ;;  %1169 = vmatpush3.msra.mxu1 %v1789_v6 }
 0x121   :  { %1170 = vmatprep.subr.mxu1 %v1795_v8 }
 0x122   :  { %1425 = vmatmul.mubr.f32.vlgmr.msra.gmra.mxu0 %v289_v48  ;;  %1171 = vmatpush3.msra.mxu1 %v1799_v9 }
 0x123   :  { %1428 = vmatpush3.msra.mxu0 %v1777_v1  ;;  %1172 = vmatprep.subr.mxu1 %v1805_v11 }
 0x124   :  { %1429 = vmatprep.subr.mxu0 %v1713_v0  ;;  %1173 = vmatpush3.msra.mxu1 %v1809_v12 }
 0x125   :  { %1430 = vmatpush3.msra.mxu0 %v1785_v4  ;;  %1174 = vmatprep.subr.mxu1 %v1815_v14 }
 0x126   :  { %1431 = vmatprep.subr.mxu0 %v1713_v0  ;;  %1175 = vmatpush3.msra.mxu1 %v1819_v15 }
 0x127   :  { %1432 = vmatpush3.msra.mxu0 %v1793_v7  ;;  %1176 = vmatprep.subr.mxu1 %v1825_v17 }
 0x128   :  { %1433 = vmatprep.subr.mxu0 %v1713_v0  ;;  %1177 = vmatpush3.msra.mxu1 %v1829_v18 }
 0x129   :  { %1434 = vmatpush3.msra.mxu0 %v1803_v10  ;;  %1178 = vmatprep.subr.mxu1 %v1835_v20 }
 0x12a   :  { %1435 = vmatprep.subr.mxu0 %v1713_v0  ;;  %1179 = vmatpush3.msra.mxu1 %v1839_v21 }
 0x12b   :  { %1436 = vmatpush3.msra.mxu0 %v1813_v13  ;;  %1180 = vmatprep.subr.mxu1 %v1845_v23 }
 0x12c   :  { %1437 = vmatprep.subr.mxu0 %v1713_v0  ;;  %1181 = vmatpush3.msra.mxu1 %v1849_v24 }
 0x12d   :  { %1438 = vmatpush3.msra.mxu0 %v1823_v16  ;;  %1182 = vmatprep.subr.mxu1 %v1855_v26 }
 0x12e   :  { %1439 = vmatprep.subr.mxu0 %v1713_v0  ;;  %1183 = vmatpush3.msra.mxu1 %v1859_v27 }
 0x12f   :  { %1440 = vmatpush3.msra.mxu0 %v1833_v19  ;;  %1184 = vmatprep.subr.mxu1 %v1865_v29 }
 0x130   :  { %1441 = vmatprep.subr.mxu0 %v1713_v0  ;;  %1185 = vmatpush3.msra.mxu1 %v1869_v30 }
 0x131   :  { %1442 = vmatpush3.msra.mxu0 %v1843_v22  ;;  %1186 = vmatprep.subr.mxu1 %v1875_v32 }
 0x132   :  { %1443 = vmatprep.subr.mxu0 %v1713_v0  ;;  %1187 = vmatpush3.msra.mxu1 %v1879_v33 }
 0x133   :  { %1444 = vmatpush3.msra.mxu0 %v1853_v25  ;;  %1188 = vmatprep.subr.mxu1 %v1885_v35 }
 0x134   :  { %1445 = vmatprep.subr.mxu0 %v1713_v0  ;;  %1189 = vmatpush3.msra.mxu1 %v1889_v36 }
 0x135   :  { %1446 = vmatpush3.msra.mxu0 %v1863_v28  ;;  %1190 = vmatprep.subr.mxu1 %v1895_v38 }
 0x136   :  { %1447 = vmatprep.subr.mxu0 %v1713_v0  ;;  %1191 = vmatpush3.msra.mxu1 %v1899_v39 }
 0x137   :  { %1448 = vmatpush3.msra.mxu0 %v1873_v31  ;;  %1192 = vmatprep.subr.mxu1 %v1905_v41 }
 0x138   :  { %1449 = vmatprep.subr.mxu0 %v1713_v0  ;;  %1193 = vmatpush3.msra.mxu1 %v1909_v42 }
 0x139   :  { %1450 = vmatpush3.msra.mxu0 %v1883_v34  ;;  %1194 = vmatprep.subr.mxu1 %v1915_v44 }
 0x13a   :  { %1451 = vmatprep.subr.mxu0 %v1713_v0  ;;  %1195 = vmatpush3.msra.mxu1 %v1919_v45 }
 0x13b   :  { %1452 = vmatpush3.msra.mxu0 %v1893_v37  ;;  %1459 = vmatprep.mubr.msk.f32.mxu0 %vm1714_vm0, %v1713_v0 }
 0x13c   :  { %1453 = vmatprep.subr.mxu0 %v1713_v0  ;;  %1196 = vmatprep.subr.mxu1 %v1925_v47 }
 0x13d   :  { %1454 = vmatpush3.msra.mxu0 %v1903_v40  ;;  %1197 = vmatpush3.msra.mxu1 %v1929_v49 }
 0x13e   :  { %1455 = vmatprep.subr.mxu0 %v1713_v0  ;;  %1218 = vmatprep.subr.mxu1 %v1779_v2 }
 0x13f   :  { %1456 = vmatpush3.msra.mxu0 %v1913_v43 }
 0x140   :  { %1457 = vmatprep.subr.mxu0 %v1713_v0 }
 0x141   :  { %1458 = vmatpush3.msra.mxu0 %v1923_v46 }
 0x142   :  { %1462 = vmatprep.subr.mxu0 %v1713_v0 }
 0x1dd   :  { %v1146_v50 = vpop.f32.mrf.mxu1 }
 0x1df   :  { %v1147_v53 = vpop.f32.mrf.mxu1 }
 0x1e0   :  { %v1148_v54 = vadd.f32 %v1147_v53, %v1146_v50 }
 0x1e2   :  { %v429_v55 = vadd.f32 %v1148_v54, %v2019_v58  ;;  %v356_v56 = vpop.f32.mrf.mxu0 }
 0x1e3   :  { %v357_v57 = vadd.f32 %v2013_v52, %v356_v56 }
 0x1e4   :  { %v432_v59 = vmax.f32 %v429_v55, 0.0  ;;  %v1426_v60 = vpop.f32.mrf.mxu0 }
 0x1e5   :  { %v360_v61 = vmax.f32 %v357_v57, 0.0 }
 0x1e6   :  { %v433_v62 = vmin.f32 %v432_v59, 1.0 }
 0x1e7   :  { %v361_v63 = vmin.f32 %v360_v61, 1.0 }
 0x1e8   :  { %1460 = vmatmul.mubr.f32.vlgmr.msra.gmra.mxu0 %v433_v62 }
 0x1e9   :  { %570 = vmatprep.mubr.f32.mxu1 %v361_v63  ;;  %1463 = vmatpush3.msra.mxu0 %v1777_v1 }
 0x1ea   :  { %571 = vmatmul.mubr.f32.vlgmr.msra.gmra.mxu1 %v1938_v51  ;;  %1464 = vmatprep.subr.mxu0 %v1713_v0 }
 0x1eb   :  { %1219 = vmatpush3.msra.mxu1 %v1781_v3  ;;  %1465 = vmatpush3.msra.mxu0 %v1785_v4 }
 0x1ec   :  { %1220 = vmatprep.subr.mxu1 %v1787_v5  ;;  %1466 = vmatprep.subr.mxu0 %v1713_v0 }
 0x1ed   :  { %1221 = vmatpush3.msra.mxu1 %v1789_v6  ;;  %1467 = vmatpush3.msra.mxu0 %v1793_v7 }
 0x1ee   :  { %1222 = vmatprep.subr.mxu1 %v1795_v8  ;;  %1468 = vmatprep.subr.mxu0 %v1713_v0 }
 0x1ef   :  { %1223 = vmatpush3.msra.mxu1 %v1799_v9  ;;  %1469 = vmatpush3.msra.mxu0 %v1803_v10 }
 0x1f0   :  { %1224 = vmatprep.subr.mxu1 %v1805_v11  ;;  %1470 = vmatprep.subr.mxu0 %v1713_v0 }
 0x1f1   :  { %1225 = vmatpush3.msra.mxu1 %v1809_v12  ;;  %1471 = vmatpush3.msra.mxu0 %v1813_v13 }
 0x1f2   :  { %1226 = vmatprep.subr.mxu1 %v1815_v14  ;;  %1472 = vmatprep.subr.mxu0 %v1713_v0 }
 0x1f3   :  { %1227 = vmatpush3.msra.mxu1 %v1819_v15  ;;  %1473 = vmatpush3.msra.mxu0 %v1823_v16 }
 0x1f4   :  { %1228 = vmatprep.subr.mxu1 %v1825_v17  ;;  %1474 = vmatprep.subr.mxu0 %v1713_v0 }
 0x1f5   :  { %1229 = vmatpush3.msra.mxu1 %v1829_v18  ;;  %1475 = vmatpush3.msra.mxu0 %v1833_v19 }
 0x1f6   :  { %1230 = vmatprep.subr.mxu1 %v1835_v20  ;;  %1476 = vmatprep.subr.mxu0 %v1713_v0 }
 0x1f7   :  { %1231 = vmatpush3.msra.mxu1 %v1839_v21  ;;  %1477 = vmatpush3.msra.mxu0 %v1843_v22 }
 0x1f8   :  { %1232 = vmatprep.subr.mxu1 %v1845_v23  ;;  %1478 = vmatprep.subr.mxu0 %v1713_v0 }
 0x1f9   :  { %1233 = vmatpush3.msra.mxu1 %v1849_v24  ;;  %1479 = vmatpush3.msra.mxu0 %v1853_v25 }
 0x1fa   :  { %1234 = vmatprep.subr.mxu1 %v1855_v26  ;;  %1480 = vmatprep.subr.mxu0 %v1713_v0 }
 0x1fb   :  { %1235 = vmatpush3.msra.mxu1 %v1859_v27  ;;  %1481 = vmatpush3.msra.mxu0 %v1863_v28 }
 0x1fc   :  { %1236 = vmatprep.subr.mxu1 %v1865_v29  ;;  %1482 = vmatprep.subr.mxu0 %v1713_v0 }
 0x1fd   :  { %1237 = vmatpush3.msra.mxu1 %v1869_v30  ;;  %1483 = vmatpush3.msra.mxu0 %v1873_v31 }
 0x1fe   :  { %1238 = vmatprep.subr.mxu1 %v1875_v32  ;;  %1484 = vmatprep.subr.mxu0 %v1713_v0 }
 0x1ff   :  { %1239 = vmatpush3.msra.mxu1 %v1879_v33  ;;  %1485 = vmatpush3.msra.mxu0 %v1883_v34 }
 0x200   :  { %1240 = vmatprep.subr.mxu1 %v1885_v35  ;;  %1486 = vmatprep.subr.mxu0 %v1713_v0 }
 0x201   :  { %1241 = vmatpush3.msra.mxu1 %v1889_v36  ;;  %1487 = vmatpush3.msra.mxu0 %v1893_v37 }
 0x202   :  { %1242 = vmatprep.subr.mxu1 %v1895_v38  ;;  %1488 = vmatprep.subr.mxu0 %v1713_v0 }
 0x203   :  { %1243 = vmatpush3.msra.mxu1 %v1899_v39  ;;  %1489 = vmatpush3.msra.mxu0 %v1903_v40 }
 0x204   :  { %1244 = vmatprep.subr.mxu1 %v1905_v41  ;;  %1490 = vmatprep.subr.mxu0 %v1713_v0 }
 0x205   :  { %1245 = vmatpush3.msra.mxu1 %v1909_v42  ;;  %1491 = vmatpush3.msra.mxu0 %v1913_v43 }
 0x206   :  { %1246 = vmatprep.subr.mxu1 %v1915_v44  ;;  %1492 = vmatprep.subr.mxu0 %v1713_v0 }
 0x207   :  { %1247 = vmatpush3.msra.mxu1 %v1919_v45  ;;  %1493 = vmatpush3.msra.mxu0 %v1923_v46 }
 0x208   :  { %1248 = vmatprep.subr.mxu1 %v1925_v47  ;;  %1494 = vmatprep.mubr.msk.f32.mxu0 %vm1714_vm0, %v1713_v0 }
 0x209   :  { %1249 = vmatpush3.msra.mxu1 %v1929_v49  ;;  %1497 = vmatprep.subr.mxu0 %v1713_v0 }
 0x20a   :  { %1270 = vmatprep.subr.mxu1 %v1779_v2 }
 0x2a8   :  { %v500_v48 = vpop.f32.mrf.mxu0 }
 0x2a9   :  { %v501_v50 = vadd.f32 %v2013_v52, %v500_v48 }
 0x2aa   :  { %v1198_v53 = vpop.f32.mrf.mxu1  ;;  %v1461_v54 = vpop.f32.mrf.mxu0 }
 0x2ab   :  { %v504_v55 = vmax.f32 %v501_v50, 0.0 }
 0x2ac   :  { %v1199_v56 = vpop.f32.mrf.mxu1 }
 0x2ad   :  { %v505_v57 = vmin.f32 %v504_v55, 1.0  ;;  %v1200_v59 = vadd.f32 %v1199_v56, %v1198_v53 }
 0x2af   :  { %v573_v60 = vadd.f32 %v1200_v59, %v2019_v58  ;;  %714 = vmatprep.mubr.f32.mxu1 %v505_v57 }
 0x2b0   :  { %715 = vmatmul.mubr.f32.vlgmr.msra.gmra.mxu1 %v1938_v51 }
 0x2b1   :  { %v576_v61 = vmax.f32 %v573_v60, 0.0  ;;  %1271 = vmatpush3.msra.mxu1 %v1781_v3 }
 0x2b2   :  { %1272 = vmatprep.subr.mxu1 %v1787_v5 }
 0x2b3   :  { %v577_v62 = vmin.f32 %v576_v61, 1.0  ;;  %1273 = vmatpush3.msra.mxu1 %v1789_v6 }
 0x2b4   :  { %1274 = vmatprep.subr.mxu1 %v1795_v8 }
 0x2b5   :  { %1495 = vmatmul.mubr.f32.vlgmr.msra.gmra.mxu0 %v577_v62  ;;  %1275 = vmatpush3.msra.mxu1 %v1799_v9 }
 0x2b6   :  { %1498 = vmatpush3.msra.mxu0 %v1777_v1  ;;  %1276 = vmatprep.subr.mxu1 %v1805_v11 }
 0x2b7   :  { %1499 = vmatprep.subr.mxu0 %v1713_v0  ;;  %1277 = vmatpush3.msra.mxu1 %v1809_v12 }
 0x2b8   :  { %1500 = vmatpush3.msra.mxu0 %v1785_v4  ;;  %1278 = vmatprep.subr.mxu1 %v1815_v14 }
 0x2b9   :  { %1501 = vmatprep.subr.mxu0 %v1713_v0  ;;  %1279 = vmatpush3.msra.mxu1 %v1819_v15 }
 0x2ba   :  { %1502 = vmatpush3.msra.mxu0 %v1793_v7  ;;  %1280 = vmatprep.subr.mxu1 %v1825_v17 }
 0x2bb   :  { %1503 = vmatprep.subr.mxu0 %v1713_v0  ;;  %1281 = vmatpush3.msra.mxu1 %v1829_v18 }
 0x2bc   :  { %1504 = vmatpush3.msra.mxu0 %v1803_v10  ;;  %1282 = vmatprep.subr.mxu1 %v1835_v20 }
 0x2bd   :  { %1505 = vmatprep.subr.mxu0 %v1713_v0  ;;  %1283 = vmatpush3.msra.mxu1 %v1839_v21 }
 0x2be   :  { %1506 = vmatpush3.msra.mxu0 %v1813_v13  ;;  %1284 = vmatprep.subr.mxu1 %v1845_v23 }
 0x2bf   :  { %1507 = vmatprep.subr.mxu0 %v1713_v0  ;;  %1285 = vmatpush3.msra.mxu1 %v1849_v24 }
 0x2c0   :  { %1508 = vmatpush3.msra.mxu0 %v1823_v16  ;;  %1286 = vmatprep.subr.mxu1 %v1855_v26 }
 0x2c1   :  { %1509 = vmatprep.subr.mxu0 %v1713_v0  ;;  %1287 = vmatpush3.msra.mxu1 %v1859_v27 }
 0x2c2   :  { %1510 = vmatpush3.msra.mxu0 %v1833_v19  ;;  %1288 = vmatprep.subr.mxu1 %v1865_v29 }
 0x2c3   :  { %1511 = vmatprep.subr.mxu0 %v1713_v0  ;;  %1289 = vmatpush3.msra.mxu1 %v1869_v30 }
 0x2c4   :  { %1512 = vmatpush3.msra.mxu0 %v1843_v22  ;;  %1290 = vmatprep.subr.mxu1 %v1875_v32 }
 0x2c5   :  { %1513 = vmatprep.subr.mxu0 %v1713_v0  ;;  %1291 = vmatpush3.msra.mxu1 %v1879_v33 }
 0x2c6   :  { %1514 = vmatpush3.msra.mxu0 %v1853_v25  ;;  %1292 = vmatprep.subr.mxu1 %v1885_v35 }
 0x2c7   :  { %1515 = vmatprep.subr.mxu0 %v1713_v0  ;;  %1293 = vmatpush3.msra.mxu1 %v1889_v36 }
 0x2c8   :  { %1516 = vmatpush3.msra.mxu0 %v1863_v28  ;;  %1294 = vmatprep.subr.mxu1 %v1895_v38 }
 0x2c9   :  { %1517 = vmatprep.subr.mxu0 %v1713_v0  ;;  %1295 = vmatpush3.msra.mxu1 %v1899_v39 }
 0x2ca   :  { %1518 = vmatpush3.msra.mxu0 %v1873_v31  ;;  %1296 = vmatprep.subr.mxu1 %v1905_v41 }
 0x2cb   :  { %1519 = vmatprep.subr.mxu0 %v1713_v0  ;;  %1297 = vmatpush3.msra.mxu1 %v1909_v42 }
 0x2cc   :  { %1520 = vmatpush3.msra.mxu0 %v1883_v34  ;;  %1298 = vmatprep.subr.mxu1 %v1915_v44 }
 0x2cd   :  { %1521 = vmatprep.subr.mxu0 %v1713_v0  ;;  %1299 = vmatpush3.msra.mxu1 %v1919_v45 }
 0x2ce   :  { %1522 = vmatpush3.msra.mxu0 %v1893_v37  ;;  %1529 = vmatprep.mubr.msk.f32.mxu0 %vm1714_vm0, %v1713_v0 }
 0x2cf   :  { %1523 = vmatprep.subr.mxu0 %v1713_v0  ;;  %1300 = vmatprep.subr.mxu1 %v1925_v47 }
 0x2d0   :  { %1524 = vmatpush3.msra.mxu0 %v1903_v40  ;;  %1301 = vmatpush3.msra.mxu1 %v1929_v49 }
 0x2d1   :  { %1525 = vmatprep.subr.mxu0 %v1713_v0  ;;  %1322 = vmatprep.subr.mxu1 %v1779_v2 }
 0x2d2   :  { %1526 = vmatpush3.msra.mxu0 %v1913_v43 }
 0x2d3   :  { %1527 = vmatprep.subr.mxu0 %v1713_v0 }
 0x2d4   :  { %1528 = vmatpush3.msra.mxu0 %v1923_v46 }
 0x2d5   :  { %1532 = vmatprep.subr.mxu0 %v1713_v0 }
 0x370   :  { %v1250_v63 = vpop.f32.mrf.mxu1 }
 0x372   :  { %v1251_v48 = vpop.f32.mrf.mxu1 }
 0x373   :  { %v1252_v50 = vadd.f32 %v1251_v48, %v1250_v63 }
 0x375   :  { %v717_v53 = vadd.f32 %v1252_v50, %v2019_v58  ;;  %v644_v54 = vpop.f32.mrf.mxu0 }
 0x376   :  { %v645_v55 = vadd.f32 %v2013_v52, %v644_v54 }
 0x377   :  { %v720_v56 = vmax.f32 %v717_v53, 0.0  ;;  %v1496_v57 = vpop.f32.mrf.mxu0 }
 0x378   :  { %v648_v59 = vmax.f32 %v645_v55, 0.0 }
 0x379   :  { %v721_v2 = vmin.f32 %v720_v56, 1.0 }
 0x37a   :  { %v649_v60 = vmin.f32 %v648_v59, 1.0 }
 0x37b   :  { %1530 = vmatmul.mubr.f32.vlgmr.msra.gmra.mxu0 %v721_v2 }
 0x37c   :  { %858 = vmatprep.mubr.f32.mxu1 %v649_v60  ;;  %1533 = vmatpush3.msra.mxu0 %v1777_v1 }
 0x37d   :  { %859 = vmatmul.mubr.f32.vlgmr.msra.gmra.mxu1 %v1938_v51  ;;  %1534 = vmatprep.subr.mxu0 %v1713_v0 }
 0x37e   :  { %1323 = vmatpush3.msra.mxu1 %v1781_v3  ;;  %1535 = vmatpush3.msra.mxu0 %v1785_v4 }
 0x37f   :  { %1324 = vmatprep.subr.mxu1 %v1787_v5  ;;  %1536 = vmatprep.subr.mxu0 %v1713_v0 }
 0x380   :  { %1325 = vmatpush3.msra.mxu1 %v1789_v6  ;;  %1537 = vmatpush3.msra.mxu0 %v1793_v7 }
 0x381   :  { %1326 = vmatprep.subr.mxu1 %v1795_v8  ;;  %1538 = vmatprep.subr.mxu0 %v1713_v0 }
 0x382   :  { %1327 = vmatpush3.msra.mxu1 %v1799_v9  ;;  %1539 = vmatpush3.msra.mxu0 %v1803_v10 }
 0x383   :  { %1328 = vmatprep.subr.mxu1 %v1805_v11  ;;  %1540 = vmatprep.subr.mxu0 %v1713_v0 }
 0x384   :  { %1329 = vmatpush3.msra.mxu1 %v1809_v12  ;;  %1541 = vmatpush3.msra.mxu0 %v1813_v13 }
 0x385   :  { %1330 = vmatprep.subr.mxu1 %v1815_v14  ;;  %1542 = vmatprep.subr.mxu0 %v1713_v0 }
 0x386   :  { %1331 = vmatpush3.msra.mxu1 %v1819_v15  ;;  %1543 = vmatpush3.msra.mxu0 %v1823_v16 }
 0x387   :  { %1332 = vmatprep.subr.mxu1 %v1825_v17  ;;  %1544 = vmatprep.subr.mxu0 %v1713_v0 }
 0x388   :  { %1333 = vmatpush3.msra.mxu1 %v1829_v18  ;;  %1545 = vmatpush3.msra.mxu0 %v1833_v19 }
 0x389   :  { %1334 = vmatprep.subr.mxu1 %v1835_v20  ;;  %1546 = vmatprep.subr.mxu0 %v1713_v0 }
 0x38a   :  { %1335 = vmatpush3.msra.mxu1 %v1839_v21  ;;  %1547 = vmatpush3.msra.mxu0 %v1843_v22 }
 0x38b   :  { %1336 = vmatprep.subr.mxu1 %v1845_v23  ;;  %1548 = vmatprep.subr.mxu0 %v1713_v0 }
 0x38c   :  { %1337 = vmatpush3.msra.mxu1 %v1849_v24  ;;  %1549 = vmatpush3.msra.mxu0 %v1853_v25 }
 0x38d   :  { %1338 = vmatprep.subr.mxu1 %v1855_v26  ;;  %1550 = vmatprep.subr.mxu0 %v1713_v0 }
 0x38e   :  { %1339 = vmatpush3.msra.mxu1 %v1859_v27  ;;  %1551 = vmatpush3.msra.mxu0 %v1863_v28 }
 0x38f   :  { %1340 = vmatprep.subr.mxu1 %v1865_v29  ;;  %1552 = vmatprep.subr.mxu0 %v1713_v0 }
 0x390   :  { %1341 = vmatpush3.msra.mxu1 %v1869_v30  ;;  %1553 = vmatpush3.msra.mxu0 %v1873_v31 }
 0x391   :  { %1342 = vmatprep.subr.mxu1 %v1875_v32  ;;  %1554 = vmatprep.subr.mxu0 %v1713_v0 }
 0x392   :  { %1343 = vmatpush3.msra.mxu1 %v1879_v33  ;;  %1555 = vmatpush3.msra.mxu0 %v1883_v34 }
 0x393   :  { %1344 = vmatprep.subr.mxu1 %v1885_v35  ;;  %1556 = vmatprep.subr.mxu0 %v1713_v0 }
 0x394   :  { %1345 = vmatpush3.msra.mxu1 %v1889_v36  ;;  %1557 = vmatpush3.msra.mxu0 %v1893_v37 }
 0x395   :  { %1346 = vmatprep.subr.mxu1 %v1895_v38  ;;  %1558 = vmatprep.subr.mxu0 %v1713_v0 }
 0x396   :  { %1347 = vmatpush3.msra.mxu1 %v1899_v39  ;;  %1559 = vmatpush3.msra.mxu0 %v1903_v40 }
 0x397   :  { %1348 = vmatprep.subr.mxu1 %v1905_v41  ;;  %1560 = vmatprep.subr.mxu0 %v1713_v0 }
 0x398   :  { %1349 = vmatpush3.msra.mxu1 %v1909_v42  ;;  %1561 = vmatpush3.msra.mxu0 %v1913_v43 }
 0x399   :  { %1350 = vmatprep.subr.mxu1 %v1915_v44  ;;  %1562 = vmatprep.subr.mxu0 %v1713_v0 }
 0x39a   :  { %1351 = vmatpush3.msra.mxu1 %v1919_v45  ;;  %1563 = vmatpush3.msra.mxu0 %v1923_v46 }
 0x39b   :  { %1352 = vmatprep.subr.mxu1 %v1925_v47  ;;  %1564 = vmatprep.mubr.msk.f32.mxu0 %vm1714_vm0, %v1713_v0 }
 0x39c   :  { %1353 = vmatpush3.msra.mxu1 %v1929_v49 }
 0x43b   :  { %v788_v1 = vpop.f32.mrf.mxu0 }
 0x43c   :  { %v789_v3 = vadd.f32 %v2013_v52, %v788_v1 }
 0x43d   :  { %v1302_v4 = vpop.f32.mrf.mxu1  ;;  %v1531_v5 = vpop.f32.mrf.mxu0 }
 0x43e   :  { %v792_v6 = vmax.f32 %v789_v3, 0.0 }
 0x43f   :  { %v1303_v7 = vpop.f32.mrf.mxu1 }
 0x440   :  { %v793_v8 = vmin.f32 %v792_v6, 1.0  ;;  %v1304_v9 = vadd.f32 %v1303_v7, %v1302_v4 }
 0x442   :  { %v861_v10 = vadd.f32 %v1304_v9, %v2019_v58  ;;  %1002 = vmatprep.mubr.f32.mxu1 %v793_v8 }
 0x443   :  { %1003 = vmatmul.mubr.f32.vlgmr.msra.gmra.mxu1 %v1938_v51 }
 0x444   :  { %v864_v11 = vmax.f32 %v861_v10, 0.0 }
 0x446   :  { %v865_v12 = vmin.f32 %v864_v11, 1.0 }
 0x448   :  { %1565 = vmatmul.mubr.f32.vlgmr.msra.gmra.mxu0 %v865_v12 }
 0x503   :  { %v1354_v0 = vpop.f32.mrf.mxu1 }
 0x505   :  { %v1355_v13 = vpop.f32.mrf.mxu1 }
 0x506   :  { %v1356_v14 = vadd.f32 %v1355_v13, %v1354_v0 }
 0x508   :  { %v1005_v15 = vadd.f32 %v1356_v14, %v2019_v58  ;;  %v932_v16 = vpop.f32.mrf.mxu0 }
 0x509   :  { %v933_v17 = vadd.f32 %v2013_v52, %v932_v16 }
 0x50a   :  { %v1008_v18 = vmax.f32 %v1005_v15, 0.0  ;;  %v1566_v19 = vpop.f32.mrf.mxu0 }
 0x50b   :  { %v936_v20 = vmax.f32 %v933_v17, 0.0 }
 0x50c   :  { %v1009_v21 = vmin.f32 %v1008_v18, 1.0 }
 0x50d   :  { %v937_v22 = vmin.f32 %v936_v20, 1.0 }
 0x50e   :  { %1011 = vst [vmem:[#allocation11] sm:$0xff] %v1009_v21 }
 0x50f   :  { %1010 = vst [vmem:[#allocation10] sm:$0xff] %v937_v22 }
 0x510   :  { %1668 = shalt.err (!%p1665_p10)
}
 0x511   :  { %1031 = dma.vmem_to_hbm [thread:$0]  %s1029_s6, 128, %s2313_s8, [#allocation12]  }
 0x512   :  { %s1677_s11 = scalar_lea.vmem %s1019_s29, 128  ;;  %p1682_p12 = scmp.lt.s32.totalorder %s1019_s29, %s1019_s29 }
 0x513   :  { %p1678_p11 = scmp.ne.s32.totalorder %s1019_s29, %s1677_s11  ;;  %p1683_p13 = scmp.lt.s32.totalorder %s1677_s11, %s1677_s11 }
 0x515   :  { %p1684_p0 = por %p1683_p13, %p1682_p12 }
 0x517   :  { %p1685_p1 = pnand %p1684_p0, %p1678_p11 }
 0x519   :  { %1688 = shalt.err (!%p1685_p1)
}
 0x51a   :  { %1021 = dma.vmem_to_hbm [thread:$0]  %s1019_s29, 128, %s2312_s7, [#allocation4]  }
 0x51b   :  { %1703 = dma.done.wait [#allocation4], 128  }
 0x51c   :  { %1704 = vsyncadd [#allocation4], 4294967168 }
 0x51d   :  { %1705 = dma.done.wait [#allocation12], 128  }
 0x51e   :  { %1706 = vsyncadd [#allocation12], 4294967168 }
 0x51f   :  { %1038 = vsyncpa [#allocation3], 1 }
 0x520   :  { %1039 = vsyncpa [#allocation6], 1 }
 0x521   :  { %1040 = vsyncpa [#allocation9], 1 }
 0x522   :  { %1041 = vsyncpa [#allocation4], 1 }
 0x523   :  { %1042 = vsyncpa [#allocation12], 1 }

</bundles_post_ra>
